<compile_context>
chip_gen: v7x
topology: tpu7x:2x2x1
jax: 0.10.0
libtpu: 0.0.40
codegen_flags: <defaults>
</compile_context>

<pallas_src>
import functools

import jax
import jax.numpy as jnp
from jax import lax
from jax.experimental import pallas as pl
from jax.experimental.pallas import tpu as pltpu


def _dice_sums_kernel(pred_ref, tgt_ref, out_ref, *, tile_p, valid_p, num_p,
                      p_per_shard, needs_mask):
    # pred_ref: (C, TP) logits tile (native dtype) for one (sample, pixel-tile)
    # tgt_ref : (1, TP) integer class-map tile
    # out_ref : (C, 128) f32 per-(sample, shard) slab, resident across the inner pixel axis;
    #           lanes 0..2 accumulate [sum(X*Y), sum(X), sum(Y)]
    p_local = pl.program_id(2)
    p_global = pl.program_id(1) * p_per_shard + p_local

    @pl.when(p_local == 0)
    def _():
        out_ref[...] = jnp.zeros_like(out_ref)

    x = pred_ref[...].astype(jnp.float32)                 # (C, TP)
    C, TP = x.shape

    # Channel softmax.  One EUP approx reciprocal per pixel, refined with one Newton step
    # (r * (2 - d*r)) -> ~f32-exact division for ~2 extra VPU ops on the (1, TP) denominator.
    m = jnp.max(x, axis=0, keepdims=True)                 # (1, TP)
    e = jnp.exp(x - m)                                    # (C, TP)
    denom = jnp.sum(e, axis=0, keepdims=True)             # (1, TP)
    r = pl.reciprocal(denom, approx=True)
    r = r * (2.0 - denom * r)                             # Newton refinement
    sm = e * r                                            # (C, TP)

    t = tgt_ref[...].astype(jnp.int32)                    # (1, TP)
    cls = lax.broadcasted_iota(jnp.int32, (C, TP), 0)
    match = t == cls                                      # (C, TP) bool; no float one-hot

    def _accumulate(sm_v, match_v):
        inter = jnp.sum(jnp.where(match_v, sm_v, 0.0), axis=1, keepdims=True)   # (C, 1)
        sum_x = jnp.sum(sm_v, axis=1, keepdims=True)                            # (C, 1)
        sum_y = jnp.sum(jnp.where(match_v, 1.0, 0.0), axis=1, keepdims=True)    # (C, 1)
        out_ref[:, 0:1] += inter
        out_ref[:, 1:2] += sum_x
        out_ref[:, 2:3] += sum_y

    if needs_mask:
        # Only the globally-last pixel tile is partial; interior tiles skip the mask entirely.
        is_edge = p_global == num_p - 1

        @pl.when(jnp.logical_not(is_edge))
        def _():
            _accumulate(sm, match)

        @pl.when(is_edge)
        def _():
            pix = lax.broadcasted_iota(jnp.int32, (1, TP), 1) + p_global * tile_p
            valid = pix < valid_p                         # (1, TP)
            # Mask BOTH sm (protects sum_x / inter) and the class match (protects sum_y):
            # the partial block's out-of-range lanes hold garbage logits AND garbage classes.
            _accumulate(jnp.where(valid, sm, 0.0), jnp.logical_and(match, valid))
    else:
        _accumulate(sm, match)


def _round_down(x, m):
    return (x // m) * m


def dice_loss_pallas(pred, target, smooth=1, tile_p=None):
    """pred: [N, C, H, W] logits (f32 or bf16); target: [N, H, W] integer class map.

    Matches the PyTorch DiceLoss.forward exactly, including its quirks:
      * `smooth` is accepted but ignored -- the reference hardcodes +1 in binary_diceloss.
      * the total is divided by (num_classes - 1) even though all C classes (incl. class 0)
        are summed; C == 1 divides by zero, exactly like the reference.  Do NOT "fix".
    """
    del smooth  # reference hardcodes +1 regardless of `smooth`
    N, C, H, W = pred.shape
    P = H * W

    pred_p = pred.reshape(N, C, P)                        # native dtype; upcast in-kernel
    tgt_dtype = jnp.int8 if C <= 127 else jnp.int32       # 8-bit class map -> minimal HBM traffic
    tgt_p = target.reshape(N, 1, P).astype(tgt_dtype)

    # Pixel-tile size: ~2 MiB of pred per tile (mem-bound kernel; big tiles amortize the
    # ~0.35 us grid-step overhead), multiple of 128 lanes, capped at 64K lanes, and never
    # larger than the image's 128-floor so only the last block can be partial.
    if tile_p is None:
        if P < 128:
            tile_p = P                                    # full-dim block (always legal)
        else:
            itemsize = jnp.dtype(pred_p.dtype).itemsize
            budget = 2 * 1024 * 1024
            tile_cap = max(128, _round_down(budget // (itemsize * C), 128))
            tile_p = min(65536, tile_cap, _round_down(P, 128))

    num_p = -(-P // tile_p)
    needs_mask = (num_p * tile_p != P)

    # Split pixel tiles into 2 "parallel" shards so both v7x TensorCores stay busy even when
    # N == 1.  Near-zero cost on single-TC v5e/v6e (output just gains a tiny shard axis).
    n_shards = 2 if (num_p >= 2 and num_p % 2 == 0) else 1
    p_per_shard = num_p // n_shards

    kernel = functools.partial(
        _dice_sums_kernel, tile_p=tile_p, valid_p=P, num_p=num_p,
        p_per_shard=p_per_shard, needs_mask=needs_mask)

    sums = pl.pallas_call(
        kernel,
        out_shape=jax.ShapeDtypeStruct((N, n_shards, C, 128), jnp.float32),
        grid=(N, n_shards, p_per_shard),
        in_specs=[
            pl.BlockSpec((None, C, tile_p), lambda n, s, p: (n, 0, s * p_per_shard + p)),
            pl.BlockSpec((None, 1, tile_p), lambda n, s, p: (n, 0, s * p_per_shard + p)),
        ],
        out_specs=pl.BlockSpec((None, None, C, 128), lambda n, s, p: (n, s, 0, 0)),
        compiler_params=pltpu.CompilerParams(
            dimension_semantics=("parallel", "parallel", "arbitrary"),
            vmem_limit_bytes=32 * 1024 * 1024,  # lifts v5e's 16 MiB default; default on v6e/v7x
        ),
    )(pred_p, tgt_p)

    # Tiny scalar glue in plain JAX: sum partials over batch and shards, then the dice formula.
    inter = jnp.sum(sums[..., 0], axis=(0, 1))            # (C,)
    sum_x = jnp.sum(sums[..., 1], axis=(0, 1))
    sum_y = jnp.sum(sums[..., 2], axis=(0, 1))
    dice_per_class = 1.0 - (2.0 * inter + 1.0) / (sum_x + sum_y + 1.0)
    return jnp.sum(dice_per_class) / (C - 1)


def dice_loss_ref(pred, target):
    """Pure-JAX reference mirroring the PyTorch module."""
    N, C, H, W = pred.shape
    sm = jax.nn.softmax(pred.astype(jnp.float32), axis=1)
    onehot = (target[:, None, :, :] == jnp.arange(C)[None, :, None, None]).astype(jnp.float32)
    total = 0.0
    for c in range(C):
        X = sm[:, c].reshape(N, -1)
        Y = onehot[:, c].reshape(N, -1)
        inter = jnp.sum(X * Y)
        total = total + (1.0 - (2.0 * inter + 1.0) / (jnp.sum(X) + jnp.sum(Y) + 1.0))
    return total / (C - 1)


if __name__ == "__main__":
    key = jax.random.PRNGKey(0)
    k1, k2, k3, k4, k5, k6 = jax.random.split(key, 6)

    # Newton-refined reciprocal -> near-exact f32 softmax; only reduction-order noise remains.
    TOL = dict(rtol=2e-4, atol=1e-5)

    # Case 1: single pixel tile per sample (P = 256 -> one 256-lane tile, no mask, no shard).
    N, C, H, W = 2, 4, 16, 16
    pred = jax.random.normal(k1, (N, C, H, W), dtype=jnp.float32)
    target = jax.random.randint(k2, (N, H, W), 0, C, dtype=jnp.int32)
    loss = jax.block_until_ready(dice_loss_pallas(pred, target))
    ref = jax.block_until_ready(dice_loss_ref(pred, target))
    assert jnp.allclose(loss, ref, **TOL), (loss, ref)

    # Case 2: same inputs, forced 128-lane tiles -> exercises the 2-shard "parallel" pixel
    # split (num_p = 2) and the shard-sum epilogue.
    loss2 = jax.block_until_ready(dice_loss_pallas(pred, target, tile_p=128))
    assert jnp.allclose(loss2, ref, **TOL), (loss2, ref)

    # Case 3: ragged spatial size (P = 400, tile 384 -> 2 tiles, partial last block) ->
    # exercises shards + the edge-tile validity mask (no jnp.pad of pred anymore).
    N3, C3, H3, W3 = 2, 5, 20, 20
    pred3 = jax.random.normal(k3, (N3, C3, H3, W3), dtype=jnp.float32)
    target3 = jax.random.randint(k4, (N3, H3, W3), 0, C3, dtype=jnp.int32)
    loss3 = jax.block_until_ready(dice_loss_pallas(pred3, target3))
    ref3 = jax.block_until_ready(dice_loss_ref(pred3, target3))
    assert jnp.allclose(loss3, ref3, **TOL), (loss3, ref3)

    # Case 4: bf16 logits passthrough, N=1, P=576 with forced 128-lane tiles (5 tiles, odd ->
    # single shard) -> exercises multi-tile accumulation into the resident output block plus
    # the edge mask, at half the pred HBM traffic.
    N4, C4, H4, W4 = 1, 3, 24, 24
    pred4 = jax.random.normal(k5, (N4, C4, H4, W4), dtype=jnp.float32).astype(jnp.bfloat16)
    target4 = jax.random.randint(k6, (N4, H4, W4), 0, C4, dtype=jnp.int32)
    loss4 = jax.block_until_ready(dice_loss_pallas(pred4, target4, tile_p=128))
    ref4 = jax.block_until_ready(dice_loss_ref(pred4, target4))
    assert jnp.allclose(loss4, ref4, **TOL), (loss4, ref4)

    print("KERNEL_OK")
</pallas_src>

<mosaic_0001>
module attributes {stable_mosaic.version = 11 : i64} {
  func.func @_dice_sums_kernel(%arg0: i32, %arg1: i32, %arg2: i32, %arg3: memref<1x4x256xf32, #tpu.memory_space<vmem>>, %arg4: memref<1x1x256xi8, #tpu.memory_space<vmem>>, %arg5: memref<1x1x4x128xf32, #tpu.memory_space<vmem>>) attributes {dimension_semantics = [#tpu.dimension_semantics<parallel>, #tpu.dimension_semantics<parallel>, #tpu.dimension_semantics<arbitrary>], iteration_bounds = array<i64: 2, 1, 1>, scalar_prefetch = 0 : i64, scratch_operands = 0 : i64, tpu.core_type = #tpu.core_type<tc>, window_params = [{transform_indices = @transform_0, window_bounds = array<i64: 1, 4, 256>}, {transform_indices = @transform_1, window_bounds = array<i64: 1, 1, 256>}, {transform_indices = @transform_2, window_bounds = array<i64: 1, 1, 4, 128>}]} {
    %c0_i32 = arith.constant 0 : i32
    %0 = arith.cmpi eq, %arg2, %c0_i32 : i32
    %1 = arith.extui %0 : i1 to i32
    %c0_i32_0 = arith.constant 0 : i32
    %2 = arith.cmpi ne, %1, %c0_i32_0 : i32
    scf.if %2 {
      %cst_36 = arith.constant 0.000000e+00 : f32
      %54 = vector.broadcast %cst_36 : f32 to vector<4x128xf32>
      %c0_37 = arith.constant 0 : index
      %c0_38 = arith.constant 0 : index
      %c0_39 = arith.constant 0 : index
      %c0_40 = arith.constant 0 : index
      %55 = vector.load %arg5[%c0_37, %c0_38, %c0_39, %c0_40] : memref<1x1x4x128xf32, #tpu.memory_space<vmem>>, vector<1x1x4x128xf32>
      %56 = vector.shape_cast %55 : vector<1x1x4x128xf32> to vector<4x128xf32>
      %57 = vector.shape_cast %54 : vector<4x128xf32> to vector<1x1x4x128xf32>
      tpu.vector_store %arg5[%c0_37, %c0_38, %c0_39, %c0_40], %57 {strides = array<i32>} : memref<1x1x4x128xf32, #tpu.memory_space<vmem>>, vector<1x1x4x128xf32>,
    } else {
    }
    %c0 = arith.constant 0 : index
    %c0_1 = arith.constant 0 : index
    %c0_2 = arith.constant 0 : index
    %3 = vector.load %arg3[%c0, %c0_1, %c0_2] : memref<1x4x256xf32, #tpu.memory_space<vmem>>, vector<1x4x256xf32>
    %4 = vector.shape_cast %3 : vector<1x4x256xf32> to vector<4x256xf32>
    %cst = arith.constant dense<0xFF800000> : vector<256xf32>
    %5 = vector.multi_reduction <maximumf>, %4, %cst [0] : vector<4x256xf32> to vector<256xf32>
    %6 = vector.shape_cast %5 : vector<256xf32> to vector<1x256xf32>
    %7 = vector.broadcast %6 : vector<1x256xf32> to vector<4x256xf32>
    %8 = arith.subf %4, %7 : vector<4x256xf32>
    %9 = math.exp %8 : vector<4x256xf32>
    %cst_3 = arith.constant dense<0.000000e+00> : vector<256xf32>
    %10 = vector.multi_reduction <add>, %9, %cst_3 [0] : vector<4x256xf32> to vector<256xf32>
    %11 = vector.shape_cast %10 : vector<256xf32> to vector<1x256xf32>
    %12 = tpu.reciprocal %11 {approx = true} : vector<1x256xf32> -> vector<1x256xf32>
    %13 = arith.mulf %11, %12 : vector<1x256xf32>
    %cst_4 = arith.constant 2.000000e+00 : f32
    %14 = vector.broadcast %cst_4 : f32 to vector<1x256xf32>
    %15 = arith.subf %14, %13 : vector<1x256xf32>
    %16 = arith.mulf %12, %15 : vector<1x256xf32>
    %17 = vector.broadcast %16 : vector<1x256xf32> to vector<4x256xf32>
    %18 = arith.mulf %9, %17 : vector<4x256xf32>
    %c0_5 = arith.constant 0 : index
    %c0_6 = arith.constant 0 : index
    %c0_7 = arith.constant 0 : index
    %19 = vector.load %arg4[%c0_5, %c0_6, %c0_7] : memref<1x1x256xi8, #tpu.memory_space<vmem>>, vector<1x1x256xi8>
    %20 = vector.shape_cast %19 : vector<1x1x256xi8> to vector<1x256xi8>
    %21 = arith.extsi %20 : vector<1x256xi8> to vector<1x256xi32>
    %22 = tpu.iota {dimensions = array<i32: 0>} : vector<4x256xi32>
    %23 = vector.broadcast %21 : vector<1x256xi32> to vector<4x256xi32>
    %24 = arith.cmpi eq, %23, %22 : vector<4x256xi32>
    %cst_8 = arith.constant 0.000000e+00 : f32
    %25 = vector.broadcast %cst_8 : f32 to vector<4x256xf32>
    %26 = arith.select %24, %18, %25 : vector<4x256xi1>, vector<4x256xf32>
    %cst_9 = arith.constant dense<0.000000e+00> : vector<4xf32>
    %27 = vector.multi_reduction <add>, %26, %cst_9 [1] : vector<4x256xf32> to vector<4xf32>
    %28 = vector.shape_cast %27 : vector<4xf32> to vector<4x1xf32>
    %cst_10 = arith.constant dense<0.000000e+00> : vector<4xf32>
    %29 = vector.multi_reduction <add>, %18, %cst_10 [1] : vector<4x256xf32> to vector<4xf32>
    %30 = vector.shape_cast %29 : vector<4xf32> to vector<4x1xf32>
    %cst_11 = arith.constant 1.000000e+00 : f32
    %cst_12 = arith.constant 0.000000e+00 : f32
    %31 = vector.broadcast %cst_11 : f32 to vector<4x256xf32>
    %32 = vector.broadcast %cst_12 : f32 to vector<4x256xf32>
    %33 = arith.select %24, %31, %32 : vector<4x256xi1>, vector<4x256xf32>
    %cst_13 = arith.constant dense<0.000000e+00> : vector<4xf32>
    %34 = vector.multi_reduction <add>, %33, %cst_13 [1] : vector<4x256xf32> to vector<4xf32>
    %35 = vector.shape_cast %34 : vector<4xf32> to vector<4x1xf32>
    %c0_14 = arith.constant 0 : index
    %c0_15 = arith.constant 0 : index
    %c0_16 = arith.constant 0 : index
    %c0_17 = arith.constant 0 : index
    %36 = vector.load %arg5[%c0_14, %c0_15, %c0_16, %c0_17] : memref<1x1x4x128xf32, #tpu.memory_space<vmem>>, vector<1x1x4x1xf32>
    %37 = vector.shape_cast %36 : vector<1x1x4x1xf32> to vector<4x1xf32>
    %38 = arith.addf %37, %28 : vector<4x1xf32>
    %c0_18 = arith.constant 0 : index
    %c0_19 = arith.constant 0 : index
    %c0_20 = arith.constant 0 : index
    %c0_21 = arith.constant 0 : index
    %39 = vector.load %arg5[%c0_18, %c0_19, %c0_20, %c0_21] : memref<1x1x4x128xf32, #tpu.memory_space<vmem>>, vector<1x1x4x1xf32>
    %40 = vector.shape_cast %39 : vector<1x1x4x1xf32> to vector<4x1xf32>
    %41 = vector.shape_cast %38 : vector<4x1xf32> to vector<1x1x4x1xf32>
    tpu.vector_store %arg5[%c0_18, %c0_19, %c0_20, %c0_21], %41 {strides = array<i32>} : memref<1x1x4x128xf32, #tpu.memory_space<vmem>>, vector<1x1x4x1xf32>,
    %c0_22 = arith.constant 0 : index
    %c0_23 = arith.constant 0 : index
    %c0_24 = arith.constant 0 : index
    %c1 = arith.constant 1 : index
    %42 = vector.load %arg5[%c0_22, %c0_23, %c0_24, %c1] : memref<1x1x4x128xf32, #tpu.memory_space<vmem>>, vector<1x1x4x1xf32>
    %43 = vector.shape_cast %42 : vector<1x1x4x1xf32> to vector<4x1xf32>
    %44 = arith.addf %43, %30 : vector<4x1xf32>
    %c0_25 = arith.constant 0 : index
    %c0_26 = arith.constant 0 : index
    %c0_27 = arith.constant 0 : index
    %c1_28 = arith.constant 1 : index
    %45 = vector.load %arg5[%c0_25, %c0_26, %c0_27, %c1_28] : memref<1x1x4x128xf32, #tpu.memory_space<vmem>>, vector<1x1x4x1xf32>
    %46 = vector.shape_cast %45 : vector<1x1x4x1xf32> to vector<4x1xf32>
    %47 = vector.shape_cast %44 : vector<4x1xf32> to vector<1x1x4x1xf32>
    tpu.vector_store %arg5[%c0_25, %c0_26, %c0_27, %c1_28], %47 {strides = array<i32>} : memref<1x1x4x128xf32, #tpu.memory_space<vmem>>, vector<1x1x4x1xf32>,
    %c0_29 = arith.constant 0 : index
    %c0_30 = arith.constant 0 : index
    %c0_31 = arith.constant 0 : index
    %c2 = arith.constant 2 : index
    %48 = vector.load %arg5[%c0_29, %c0_30, %c0_31, %c2] : memref<1x1x4x128xf32, #tpu.memory_space<vmem>>, vector<1x1x4x1xf32>
    %49 = vector.shape_cast %48 : vector<1x1x4x1xf32> to vector<4x1xf32>
    %50 = arith.addf %49, %35 : vector<4x1xf32>
    %c0_32 = arith.constant 0 : index
    %c0_33 = arith.constant 0 : index
    %c0_34 = arith.constant 0 : index
    %c2_35 = arith.constant 2 : index
    %51 = vector.load %arg5[%c0_32, %c0_33, %c0_34, %c2_35] : memref<1x1x4x128xf32, #tpu.memory_space<vmem>>, vector<1x1x4x1xf32>
    %52 = vector.shape_cast %51 : vector<1x1x4x1xf32> to vector<4x1xf32>
    %53 = vector.shape_cast %50 : vector<4x1xf32> to vector<1x1x4x1xf32>
    tpu.vector_store %arg5[%c0_32, %c0_33, %c0_34, %c2_35], %53 {strides = array<i32>} : memref<1x1x4x128xf32, #tpu.memory_space<vmem>>, vector<1x1x4x1xf32>,
    return
  }
  func.func @transform_0(%arg0: i32, %arg1: i32, %arg2: i32) -> (i32, i32, i32) {
    %c1_i32 = arith.constant 1 : i32
    %0 = arith.muli %arg1, %c1_i32 : i32
    %1 = arith.addi %0, %arg2 : i32
    %c0_i32 = arith.constant 0 : i32
    %c0_i32_0 = arith.constant 0 : i32
    return %arg0, %c0_i32, %1 : i32, i32, i32
  }
  func.func @transform_1(%arg0: i32, %arg1: i32, %arg2: i32) -> (i32, i32, i32) {
    %c1_i32 = arith.constant 1 : i32
    %0 = arith.muli %arg1, %c1_i32 : i32
    %1 = arith.addi %0, %arg2 : i32
    %c0_i32 = arith.constant 0 : i32
    %c0_i32_0 = arith.constant 0 : i32
    return %arg0, %c0_i32, %1 : i32, i32, i32
  }
  func.func @transform_2(%arg0: i32, %arg1: i32, %arg2: i32) -> (i32, i32, i32, i32) {
    %c0_i32 = arith.constant 0 : i32
    %c0_i32_0 = arith.constant 0 : i32
    %c0_i32_1 = arith.constant 0 : i32
    return %arg0, %arg1, %c0_i32, %c0_i32_0 : i32, i32, i32, i32
  }
}

</mosaic_0001>

<bundles_post_ra>
// kernel: tpu_custom_call.1
= control target key start
LH: loop header
LB: loop body
LE: loop exit
PB: predicated region body
PF: predicated region fallthrough
CT: control target
= control target key end

     0   :  { %7 = vsyncpa [#allocation3], 0  ;;  %s895_s0 = inlined_call_operand.hbm [shape: f32[2,4,256], index: 0, kind: input, shape index: {}]   ;;  %s896_s1 = inlined_call_operand.vmem [shape: s8[2,1,256], index: 1, kind: input, shape index: {}]   ;;  %s897_s2 = inlined_call_operand.hbm [shape: f32[2,1,4,128], index: 2, kind: output, shape index: {}]  }
   0x1   :  { %9 = vsyncpa [#allocation3 + $0x1], 0 }
   0x2   :  { %10 = vsyncpa [#allocation4], 0 }
   0x3   :  { %12 = vsyncpa [#allocation4 + $0x1], 0  ;;  %s681_s9 = smov 0   ;;  %s683_s10 = smov 0  }
   0x4   :  { %s685_s11 = smov 0   ;;  %s687_s12 = smov 0  }
   0x5   :  { %s689_s13 = smov 0   ;;  %s691_s14 = smov 0  }
   0x6 LB: > { %s463_s15 = sadd.s32 4294967295, %s661_s14   ;;  %s464_s16 = sadd.s32 4294967294, %s661_s14   ;;  %s661_s14 = sphi %s691_s14, %s18_s14   ;;  %s657_s13 = sphi %s689_s13, %s917_s13   ;;  %s653_s12 = sphi %s687_s12, %s916_s12   ;;  %s649_s11 = sphi %s685_s11, %s915_s11   ;;  %s645_s10 = sphi %s683_s10, %s914_s10   ;;  %s641_s9 = sphi %s681_s9, %s913_s9  }
   0x7   : > { %s37_s17 = sadd.s32 1, %s657_s13  ;;  %s48_s18 = sadd.s32 1, %s649_s11 }
   0x8   : > { %p39_p0 = scmp.ge.s32.totalorder %s37_s17, 2  ;;  %p55_p1 = scmp.ne.s32.totalorder %s649_s11, %s645_s10 }
   0x9   : > { %p56_p2 = scmp.eq.s32.totalorder %s661_s14, 0  ;;  %p61_p3 = scmp.ne.s32.totalorder %s645_s10, %s641_s9 }
   0xa   : > { %s919_s17 = smov (%p39_p0, %s37_s17), 0  ;;  %p62_p5 = scmp.eq.s32.totalorder %s463_s15, 0 }
   0xb   : > { %p722_p4 = por %p56_p2, %p55_p1  ;;  %s43_s20 = ssub.s32 %s657_s13, %s919_s17 }
   0xc   : > { %p117_p6 = scmp.eq.s32.totalorder %s463_s15, 1  ;;  %p46_p7 = scmp.eq.s32.totalorder %s43_s20, 0 }
   0xd   : > { %p728_p8 = por %p62_p5, %p61_p3  ;;  %p123_p10 = scmp.eq.s32.totalorder %s464_s16, 1 }
   0xe   : > { %p732_p9 = por %p117_p6, %p55_p1  ;;  %p491_p13 = scmp.lt.s32.totalorder %s661_s14, 2 }
   0xf   : > { %s737_s23 = scalar_select %p46_p7, %s649_s11, %s48_s18  }
  0x10   : > { %s901_s22 = scalar_select %p732_p9, 1, 0 }
  0x11   : > { %p739_p11 = por %p123_p10, %p61_p3  ;;  %s143_s25 = sand.u32 1, %s649_s11  }
  0x12   : > { %s467_s26 = sshll.u32 %s143_s25, 3  ;;  %s478_s27 = sshll.u32 %s657_s13, 7 }
  0x13   : > { %s902_s24 = scalar_select %p739_p11, 1, 0 }
  0x14   : > { %s750_s30 = scalar_lea.hbm %s895_s0, %s478_s27  ;;  %s147_s3 = scalar_lea.vmem [#allocation2], %s467_s26 }
  0x15   : > { %s158_s4 = sshll.u32 %s147_s3, 4  ;;  %p756_p0 = pnand %p491_p13, %p722_p4  ;;  %s752_s4 = int_to_ptr.vmem [resolvable:$true] %s158_s4 }
  0x16   : > { %s144_s6 = scalar_lea.sflag [#allocation3], %s143_s25  ;;  %s549_s7 = scalar_lea.hbm %s750_s30, 128 }
  0x17   : > { %p550_p3 = scmp.ne.s32.totalorder %s750_s30, %s549_s7  ;;  %p551_p5 = pneg %p756_p0 }
  0x18   : > { %s554_s16 = scalar_lea.hbm %s895_s0, 256  ;;  %p555_p4 = scmp.lt.u32.totalorder %s750_s30, %s895_s0 }
  0x19   : > { %p552_p6 = pnand %p551_p5, %p550_p3  ;;  %p556_p10 = scmp.lt.u32.totalorder %s554_s16, %s549_s7 }
  0x1a   : > { %p558_p12 = scmp.lt.u32.totalorder %s549_s7, %s750_s30 }
  0x1b   : > { %p553_p7 = pneg %p552_p6  ;;  %p557_p13 = por %p556_p10, %p555_p4 }
  0x1d   : > { %p559_p1 = por %p558_p12, %p557_p13 }
  0x1f   : > { %p560_p2 = pnand %p559_p1, %p553_p7 }
  0x21   : > { %563 = shalt.err (!%p560_p2)
}
  0x22   : > { %s564_s20 = scalar_lea.vmem %s752_s4, 128  ;;  %s663_s25 = smov [#allocation2]  }
  0x23   : > { %p565_p3 = scmp.ne.s32.totalorder %s752_s4, %s564_s20  ;;  %s569_s26 = sshll.u32 %s663_s25, 4  ;;  %s570_s26 = int_to_ptr.vmem [resolvable:$false] %s569_s26 }
  0x24   : > { %s571_s27 = scalar_lea.vmem %s570_s26, 256  ;;  %p572_p9 = scmp.lt.s32.totalorder %s752_s4, %s570_s26 }
  0x25   : > { %p567_p6 = pnand %p565_p3, %p551_p5  ;;  %p573_p4 = scmp.lt.s32.totalorder %s571_s27, %s564_s20 }
  0x27   : > { %p568_p11 = pneg %p567_p6  ;;  %p574_p10 = por %p573_p4, %p572_p9 }
  0x29   : > { %p575_p12 = pnand %p574_p10, %p568_p11 }
  0x2b   : > { %578 = shalt.err (!%p575_p12)
}
  0x2c   : > { %486 = dma.hbm_to_vmem [thread:$0]  (!%p756_p0), %s750_s30, 128, %s752_s4, %s144_s6  }
  0x2d   : > { %p904_p1 = scmp.lt.s32.totalorder %s661_s14, 3  ;;  %p905_p2 = scmp.ge.s32.totalorder %s661_s14, 1 }
  0x2f   : > { %p178_p5 = pnand %p905_p2, %p904_p1 }
  0x30   : > { %s792_s28 = sand.u32 (!%p178_p5), 1, %s645_s10  }
  0x31   : > { %181 = sbr.rel (%p178_p5) target bundleno = 310 (0x136), region = 28  ;;  %s471_s29 = sshll.u32 (!%p178_p5), %s792_s28, 3 }
  0x32   : > { %s184_s3 = scalar_lea.sflag (!%p178_p5), [#allocation3], %s792_s28  ;;  %s187_s7 = scalar_lea.vmem (!%p178_p5), [#allocation2], %s471_s29 }
  0x38   : > { %632 = dma.done.wait (%p728_p8), %s184_s3, 128  }
  0x39   : > { %634 = vsyncadd (%p728_p8), %s184_s3, 4294967168  ;;  %p221_p9 = scmp.lt.s32.totalorder %s653_s12, 1  ;;  %v293_v0 = vlaneseq  ;;  %s472_s30 = sshll.u32 %s792_s28, 2  ;;  %v664_v2 = vmov 0.0   ;;  %vm239_vm0 = vcmask 1043456   ;;  %v235_v5 = vld [vmem:[%s187_s7] sm:$0xff] }
  0x3a   : > { %s803_s5 = scalar_lea.vmem [#allocation5], %s472_s30  ;;  %v237_v7 = vcombine.high %v235_v5, %v235_v5  ;;  %v240_v8 = vsel %vm239_vm0, %v235_v5, -inf  ;;  %vm337_vm3 = vcmask 3072   ;;  %vm341_vm4 = vcmask 11272   ;;  %s475_s21 = sshll.u32 %s653_s12, 6 }
  0x3b   : > { %s222_s4 = scalar_select %p221_p9, %s653_s12, 1  ;;  %v294_v1 = vshrl.u32 %v293_v0, 7  ;;  %234 = vst [vmem:[%s803_s5] sm:$0xf] %v664_v2  ;;  %v241_v10 = vrot.slane %v240_v8, 4  ;;  %vm345_vm5 = vcmask 19472  }
  0x3c   : > { %v247_v11 = vsel %vm239_vm0, %v237_v7, -inf  ;;  %s362_s18 = sshll.u32 %s803_s5, 4  ;;  %s845_s25 = scalar_lea.hbm %s897_s2, %s475_s21  ;;  %s847_s18 = int_to_ptr.vmem [resolvable:$true] %s362_s18 }
  0x3d   : > { %s473_s6 = sshll.u32 %s222_s4, 1  ;;  %v297_v3 = vsub.s32 0, %v294_v1  ;;  %v301_v4 = vsub.s32 4, %v294_v1  ;;  %v242_v14 = vmax.f32 %v240_v8, %v241_v10  ;;  %v248_v15 = vrot.slane %v247_v11, 4  ;;  %s348_s26 = scalar_lea.sflag [#allocation4], %s792_s28 }
  0x3e   : > { %s227_s16 = scalar_lea.vmem %s896_s1, %s473_s6  ;;  %s579_s27 = scalar_lea.vmem %s847_s18, 64 }
  0x3f   : > { %v291_v6 = vld [vmem:[%s227_s16] sm:$0x3]  ;;  %v243_v18 = vrot.slane %v242_v14, 2  ;;  %v249_v19 = vmax.f32 %v247_v11, %v248_v15  ;;  %p580_p8 = scmp.ne.s32.totalorder %s847_s18, %s579_s27  ;;  %p910_p11 = scmp.ne.s32.totalorder %s901_s22, 0 }
  0x40   : > { %v292_v9 = vunpack.c.0.s8 %v291_v6  ;;  %s665_s12 = smov [#allocation5]  }
  0x41   : > { %v244_v22 = vmax.f32 %v242_v14, %v243_v18  ;;  %v250_v23 = vrot.slane %v249_v19, 2  ;;  %p581_p0 = pnand %p580_p8, %p910_p11  ;;  %s583_s29 = sshll.u32 %s665_s12, 4  ;;  %s584_s29 = int_to_ptr.vmem [resolvable:$false] %s583_s29 }
  0x42   : > { %v298_v12 = vrot.slane %v292_v9, %v297_v3  ;;  %v302_v13 = vrot.slane %v292_v9, %v301_v4  ;;  %v335_v8 = vld [vmem:[%s803_s5] sm:$0xf]  ;;  %s585_s3 = scalar_lea.vmem %s584_s29, 128  ;;  %p586_p13 = scmp.lt.s32.totalorder %s847_s18, %s584_s29 }
  0x43   : > { %v245_v28 = vrot.slane %v244_v22, 1  ;;  %v251_v29 = vmax.f32 %v249_v19, %v250_v23  ;;  %p582_p7 = pneg %p581_p0  ;;  %p587_p3 = scmp.lt.s32.totalorder %s585_s3, %s579_s27 }
  0x44   : > { %v306_v16 = vrot.slane %v298_v12, %v297_v3  ;;  %v310_v17 = vrot.slane %v302_v13, %v297_v3 }
  0x45   : > { %v246_v31 = vmax.f32 %v244_v22, %v245_v28  ;;  %v252_v32 = vrot.slane %v251_v29, 1  ;;  %p588_p6 = por %p587_p3, %p586_p13 }
  0x46   : > { %vm811_vm1 = vcmp.eq.s32.totalorder %v306_v16, %v294_v1  ;;  %vm815_vm2 = vcmp.eq.s32.totalorder %v310_v17, %v294_v1 }
  0x47   : > { %v328_v24 = vsel %vm811_vm1, 1.0, %v664_v2  ;;  %v329_v25 = vsel %vm815_vm2, 1.0, %v664_v2  ;;  %v253_v33 = vmax.f32 %v251_v29, %v252_v32  ;;  %p589_p4 = pnand %p588_p6, %p582_p7 }
  0x48   : > { %v330_v26 = vsel %vm239_vm0, %v328_v24, 0.0  ;;  %v331_v27 = vsel %vm239_vm0, %v329_v25, 0.0 }
  0x49   : > { %v332_v30 = vadd.f32 %v331_v27, %v330_v26  ;;  %v256_v34 = vcombine.low %v246_v31, %v253_v33 }
  0x4b   : > { %333 = vadd.xlane.f32.xlu1 %v332_v30  ;;  %v258_v35 = vsub.f32 %v235_v5, %v256_v34 }
  0x4d   : > { %v259_v36 = vmul.f32 1.442695, %v258_v35 }
  0x4f   : > { %543 = vpow2.f32 %v259_v36 }
  0x59   : > { %v544_v37 = vpop.eup %543 }
  0x5a   : > { %v262_v38 = vcombine.high %v544_v37, %v544_v37  ;;  %v264_v39 = vsel %vm239_vm0, %v544_v37, 0.0 }
  0x5b   : > { %v265_v40 = vrot.slane %v264_v39, 4 }
  0x5c   : > { %v271_v41 = vsel %vm239_vm0, %v262_v38, 0.0 }
  0x5d   : > { %v266_v42 = vadd.f32 %v265_v40, %v264_v39  ;;  %v272_v43 = vrot.slane %v271_v41, 4 }
  0x5f   : > { %v267_v44 = vrot.slane %v266_v42, 2  ;;  %v273_v45 = vadd.f32 %v272_v43, %v271_v41 }
  0x61   : > { %v268_v46 = vadd.f32 %v267_v44, %v266_v42  ;;  %v274_v47 = vrot.slane %v273_v45, 2 }
  0x63   : > { %v269_v48 = vrot.slane %v268_v46, 1  ;;  %v275_v49 = vadd.f32 %v274_v47, %v273_v45 }
  0x65   : > { %v270_v50 = vadd.f32 %v269_v48, %v268_v46  ;;  %v276_v51 = vrot.slane %v275_v49, 1 }
  0x67   : > { %v277_v52 = vadd.f32 %v276_v51, %v275_v49  ;;  %545 = vrcp.f32 %v270_v50 }
  0x69   : > { %547 = vrcp.f32 %v277_v52 }
  0x71   : > { %v546_v53 = vpop.eup %545 }
  0x72   : > { %v280_v54 = vmul.f32 %v546_v53, %v270_v50 }
  0x73   : > { %v548_v55 = vpop.eup %547 }
  0x74   : > { %v281_v56 = vmul.f32 %v548_v55, %v277_v52  ;;  %v282_v57 = vsub.f32 2.0, %v280_v54 }
  0x76   : > { %v283_v58 = vsub.f32 2.0, %v281_v56  ;;  %v284_v59 = vmul.f32 %v546_v53, %v282_v57 }
  0x78   : > { %v285_v60 = vmul.f32 %v548_v55, %v283_v58 }
  0x7a   : > { %v288_v61 = vcombine.low %v284_v59, %v285_v60 }
  0x7c   : > { %v290_v62 = vmul.f32 %v544_v37, %v288_v61 }
  0x7e   : > { %v314_v63 = vcombine.high %v290_v62, %v290_v62  ;;  %v316_v0 = vsel %vm811_vm1, %v290_v62, 0.0  ;;  %v323_v4 = vsel %vm239_vm0, %v290_v62, 0.0 }
  0x7f   : > { %v318_v1 = vsel %vm239_vm0, %v316_v0, 0.0 }
  0x80   : > { %v317_v2 = vsel %vm815_vm2, %v314_v63, 0.0  ;;  %v324_v5 = vsel %vm239_vm0, %v314_v63, 0.0 }
  0x81   : > { %v319_v3 = vsel %vm239_vm0, %v317_v2, 0.0  ;;  %v325_v7 = vadd.f32 %v324_v5, %v323_v4 }
  0x82   : > { %v320_v6 = vadd.f32 %v319_v3, %v318_v1 }
  0x84   : > { %321 = vadd.xlane.f32.xlu0 %v320_v6 }
  0x88   : > { %326 = vadd.xlane.f32.xlu0 %v325_v7 }
  0xd8   : > { %v334_v14 = vpop.xlane.xlu1 %333 }
 0x111   : > { %v322_v9 = vpop.xlane.xlu0 %321 }
 0x112   : > { %v336_v10 = vadd.f32 %v335_v8, %v322_v9 }
 0x114   : > { %338 = vst.msk [vmem:[%s803_s5] sm:$0xf] %vm337_vm3, %v336_v10 }
 0x115   : > { %v327_v11 = vpop.xlane.xlu0 %326 }
 0x11b   : > { %v339_v12 = vld [vmem:[%s803_s5] sm:$0xf] }
 0x11c   : > { %v340_v13 = vadd.f32 %v339_v12, %v327_v11 }
 0x11e   : > { %342 = vst.msk [vmem:[%s803_s5] sm:$0xf] %vm341_vm4, %v340_v13 }
 0x125   : > { %v343_v15 = vld [vmem:[%s803_s5] sm:$0xf] }
 0x126   : > { %v344_v16 = vadd.f32 %v343_v15, %v334_v14 }
 0x128   : > { %346 = vst.msk [vmem:[%s803_s5] sm:$0xf] %vm345_vm5, %v344_v16 }
 0x129   : > { %592 = shalt.err (!%p589_p4)
}
 0x12a   : > { %s593_s28 = scalar_lea.hbm %s845_s25, 64  ;;  %s597_s4 = scalar_lea.hbm %s897_s2, 128 }
 0x12b   : > { %p594_p10 = scmp.ne.s32.totalorder %s845_s25, %s593_s28  ;;  %p598_p2 = scmp.lt.u32.totalorder %s845_s25, %s897_s2 }
 0x12c   : > { %p599_p5 = scmp.lt.u32.totalorder %s597_s4, %s593_s28  ;;  %p601_p8 = scmp.lt.u32.totalorder %s593_s28, %s845_s25 }
 0x12d   : > { %p595_p12 = pnand %p594_p10, %p910_p11 }
 0x12e   : > { %p600_p9 = por %p599_p5, %p598_p2 }
 0x12f   : > { %p596_p1 = pneg %p595_p12 }
 0x130   : > { %p602_p0 = por %p601_p8, %p600_p9 }
 0x132   : > { %p603_p7 = pnand %p602_p0, %p596_p1 }
 0x134   : > { %606 = shalt.err (!%p603_p7)
}
 0x135   : > { %481 = dma.vmem_to_hbm [thread:$0]  (%p910_p11), %s847_s18, 64, %s845_s25, %s348_s26  }
 0x136 PF: > { %s374_s8 = sand.u32 1, %s641_s9   ;;  %p911_p13 = scmp.ne.s32.totalorder %s902_s24, 0 }
 0x137   : > { %p912_p3 = scmp.ge.s32.totalorder %s661_s14, 2  ;;  %s375_s15 = scalar_lea.sflag [#allocation4], %s374_s8 }
 0x139   : > { %p488_p6 = pnand %p912_p3, %p911_p13 }
 0x13b   : > { %636 = dma.done.wait (!%p488_p6), %s375_s15, 64  }
 0x13c   : > { %638 = vsyncadd (!%p488_p6), %s375_s15, 4294967232  ;;  %s18_s14 = sadd.s32 1, %s661_s14   ;;  %s913_s9 = smov %s645_s10 }
 0x13d   : > { %p15_p4 = scmp.ge.s32.totalorder %s18_s14, 4   ;;  %s914_s10 = smov %s649_s11 }
 0x13e   : > { %s915_s11 = smov %s737_s23  ;;  %s916_s12 = smov %s657_s13 }
 0x13f   : > { %s917_s13 = smov %s919_s17  ;;  %17 = sbr.rel (!%p15_p4) target bundleno = 6 (0x6), region = 80 }
 0x146   :  { %380 = vsyncpa [#allocation3], 1 }
 0x147   :  { %382 = vsyncpa [#allocation3 + $0x1], 1 }
 0x148   :  { %383 = vsyncpa [#allocation4], 1 }
 0x149   :  { %385 = vsyncpa [#allocation4 + $0x1], 1 }

</bundles_post_ra>
